<compile_context>
chip_gen: v5e
topology: v5e:2x2
jax: 0.10.0
libtpu: 0.0.40
codegen_flags: <defaults>
</compile_context>

<pallas_src>
import functools
import math

import numpy as np
import jax
import jax.numpy as jnp
from jax.experimental import pallas as pl
from jax.experimental.pallas import tpu as pltpu

LANE = 128


def _round_up(x, m):
    return ((x + m - 1) // m) * m


# --------------------------------------------------------------------------
# Pallas kernels
# --------------------------------------------------------------------------

def _linear_kernel(x_ref, w_ref, b_ref, o_ref):
    # x: [TM, E] bf16, w: [E, D] bf16, b: [1, D] f32  ->  o: [TM, D] bf16
    acc = jnp.dot(x_ref[...], w_ref[...], preferred_element_type=jnp.float32)
    o_ref[...] = (acc + b_ref[...]).astype(o_ref.dtype)


def gnn2transformer_linear(x, w_bf16, b, tm=512):
    """h_node [N, E] @ W [E, D] + b -> [N, D] (bf16 out).

    No host-side pad / slice: grid = cdiv(N, tm); the partial last row tile is
    handled by Pallas (rows are independent, OOB rows are never written back).
    Row axis "parallel" -> megacore-shardable on v7x.
    """
    n, e = x.shape
    d = w_bf16.shape[1]
    tm = n if n <= tm else tm          # full-dim block when small, else 512 (8-aligned)
    b2 = b.reshape(1, d)
    return pl.pallas_call(
        _linear_kernel,
        out_shape=jax.ShapeDtypeStruct((n, d), jnp.bfloat16),
        grid=(pl.cdiv(n, tm),),
        in_specs=[
            pl.BlockSpec((tm, e), lambda i: (i, 0)),
            pl.BlockSpec((e, d), lambda i: (0, 0)),
            pl.BlockSpec((1, d), lambda i: (0, 0)),
        ],
        out_specs=pl.BlockSpec((tm, d), lambda i: (i, 0)),
        compiler_params=pltpu.CompilerParams(dimension_semantics=("parallel",)),
    )(x.astype(jnp.bfloat16), w_bf16, b2)


def _fused_last_kernel(x_ref, valid_ref, wg_ref, bg_ref, wh_ref, bh_ref, o_ref):
    # x: [TB, E] bf16 (last node of each graph), valid: [TB, 1] f32,
    # wg: [E, D] bf16, bg: [1, D] f32, wh: [D, LTpad] bf16, bh: [1, LTpad] f32
    h = (jnp.dot(x_ref[...], wg_ref[...], preferred_element_type=jnp.float32)
         + bg_ref[...]) * valid_ref[...]          # zero rows for empty graphs
    o_ref[...] = (jnp.dot(h.astype(jnp.bfloat16), wh_ref[...],
                          preferred_element_type=jnp.float32) + bh_ref[...])


def fused_last_head(x_last, valid, wg_bf16, bg, wh_bf16, bh_eff, tb=256):
    """'last'/'cls' pooling: projection + PE (pre-folded into bh_eff) + ALL
    heads in ONE pallas_call on only the B last-node rows. Lane-dense
    [B, LTpad] output; batch axis "parallel"."""
    bsz, e = x_last.shape
    d = wg_bf16.shape[1]
    ltp = wh_bf16.shape[1]
    tb = bsz if bsz <= tb else tb
    return pl.pallas_call(
        _fused_last_kernel,
        out_shape=jax.ShapeDtypeStruct((bsz, ltp), jnp.float32),
        grid=(pl.cdiv(bsz, tb),),
        in_specs=[
            pl.BlockSpec((tb, e), lambda i: (i, 0)),
            pl.BlockSpec((tb, 1), lambda i: (i, 0)),
            pl.BlockSpec((e, d), lambda i: (0, 0)),
            pl.BlockSpec((1, d), lambda i: (0, 0)),
            pl.BlockSpec((d, ltp), lambda i: (0, 0)),
            pl.BlockSpec((1, ltp), lambda i: (0, 0)),
        ],
        out_specs=pl.BlockSpec((tb, ltp), lambda i: (i, 0)),
        compiler_params=pltpu.CompilerParams(dimension_semantics=("parallel",)),
    )(x_last.astype(jnp.bfloat16), valid, wg_bf16, bg.reshape(1, d),
      wh_bf16, bh_eff)


def _mean_head_kernel(x_ref, pe_sum_ref, inv_ref, w_ref, b_ref, o_ref, acc_ref,
                      *, s_total, ts):
    # x: [ts, TB, D] bf16, pe_sum: [1, D] f32, inv: [TB, 1] f32,
    # w: [D, LTpad] bf16, b: [1, LTpad] f32, acc: [TB, D] f32 scratch
    si = pl.program_id(1)

    @pl.when(si == 0)
    def _():
        acc_ref[...] = jnp.zeros_like(acc_ref)

    x = x_ref[...].astype(jnp.float32)
    # mask out-of-bounds rows of a partial last S-tile
    pos = jax.lax.broadcasted_iota(jnp.int32, x.shape, 0) + si * ts
    x = jnp.where(pos < s_total, x, 0.0)
    acc_ref[...] += jnp.sum(x, axis=0)

    @pl.when(si == pl.num_programs(1) - 1)
    def _():
        # exact reference formula: (sum_s x + sum_s pe) * (1 / denom)
        h = (acc_ref[...] + pe_sum_ref[...]) * inv_ref[...]
        o_ref[...] = (jnp.dot(h.astype(jnp.bfloat16), w_ref[...],
                              preferred_element_type=jnp.float32) + b_ref[...])


def mean_head(padded_x, pe_sum, inv_denom, w_bf16, b, ts=256, tb=256):
    """'mean' pooling + ALL heads.

    grid = (batch tiles, S tiles) with the S reduction LAST ("arbitrary") so
    DMA of tile s+1 overlaps the VPU sum of tile s; f32 [tb, D] accumulator in
    scratch; explicit vmem limit; lane-dense [B, LTpad] output.
    """
    s, bsz, d = padded_x.shape
    ltp = w_bf16.shape[1]
    ts = s if s <= ts else ts
    tb = bsz if bsz <= tb else tb
    kernel = functools.partial(_mean_head_kernel, s_total=s, ts=ts)
    return pl.pallas_call(
        kernel,
        out_shape=jax.ShapeDtypeStruct((bsz, ltp), jnp.float32),
        grid=(pl.cdiv(bsz, tb), pl.cdiv(s, ts)),
        in_specs=[
            pl.BlockSpec((ts, tb, d), lambda bi, si: (si, bi, 0)),
            pl.BlockSpec((1, d), lambda bi, si: (0, 0)),
            pl.BlockSpec((tb, 1), lambda bi, si: (bi, 0)),
            pl.BlockSpec((d, ltp), lambda bi, si: (0, 0)),
            pl.BlockSpec((1, ltp), lambda bi, si: (0, 0)),
        ],
        out_specs=pl.BlockSpec((tb, ltp), lambda bi, si: (bi, 0)),
        scratch_shapes=[pltpu.VMEM((tb, d), jnp.float32)],
        compiler_params=pltpu.CompilerParams(
            dimension_semantics=("parallel", "arbitrary"),
            vmem_limit_bytes=32 * 1024 * 1024),
    )(padded_x, pe_sum, inv_denom, w_bf16, b)


# --------------------------------------------------------------------------
# Glue (plain JAX / numpy): pad_batch, positional-encoding table, params
# --------------------------------------------------------------------------

def positional_encoding_table(max_len, d_model):
    position = np.arange(max_len, dtype=np.float64)[:, None]
    div_term = np.exp(np.arange(0, d_model, 2, dtype=np.float64)
                      * (-math.log(10000.0) / d_model))
    pe = np.zeros((max_len, d_model), dtype=np.float32)
    pe[:, 0::2] = np.sin(position * div_term)
    pe[:, 1::2] = np.cos(position * div_term)
    return jnp.asarray(pe)


def pad_batch(h, batch, max_input_len):
    """GraphTrans pad_batch: end-aligned nodes, padding mask True at the front.

    NOTE: graphs larger than max_input_len are silently truncated to their
    LAST max_input_len nodes (intentional GraphTrans behavior).
    """
    batch_np = np.asarray(batch)
    n_graphs = int(batch_np.max()) + 1
    num_nodes = np.bincount(batch_np, minlength=n_graphs)
    max_num_nodes = int(min(int(num_nodes.max()), max_input_len))
    d = h.shape[-1]

    seq_idx, graph_idx, node_idx = [], [], []
    mask = np.ones((n_graphs, max_num_nodes), dtype=bool)
    for g in range(n_graphs):
        nodes = np.nonzero(batch_np == g)[0]
        n = min(len(nodes), max_num_nodes)
        seq_idx.append(np.arange(max_num_nodes - n, max_num_nodes, dtype=np.int32))
        graph_idx.append(np.full(n, g, dtype=np.int32))
        node_idx.append(nodes[-n:].astype(np.int32) if n else
                        np.zeros(0, np.int32))
        mask[g, max_num_nodes - n:] = False
    seq_idx = np.concatenate(seq_idx)
    graph_idx = np.concatenate(graph_idx)
    node_idx = np.concatenate(node_idx)

    padded = jnp.zeros((max_num_nodes, n_graphs, d), h.dtype)
    padded = padded.at[seq_idx, graph_idx].set(h[node_idx])
    src_padding_mask = jnp.asarray(mask)
    return padded, src_padding_mask, num_nodes, None, max_num_nodes


class GNNTransformerPallas:
    def __init__(self, num_tasks, gnn_emb_dim, d_model, max_seq_len,
                 max_input_len=16, graph_pooling="last", pos_encoder=True,
                 seed=0):
        self.num_tasks = num_tasks
        self.d_model = d_model
        self.max_seq_len = max_seq_len
        self.max_input_len = max_input_len
        self.graph_pooling = graph_pooling

        k1, k2, k3, k4 = jax.random.split(jax.random.PRNGKey(seed), 4)
        lim1 = 1.0 / math.sqrt(gnn_emb_dim)
        lim2 = 1.0 / math.sqrt(d_model)
        # gnn2transformer: nn.Linear(gnn_emb_dim, d_model)
        self.w_g2t = jax.random.uniform(k1, (gnn_emb_dim, d_model),
                                        jnp.float32, -lim1, lim1)
        self.b_g2t = jax.random.uniform(k2, (d_model,), jnp.float32, -lim1, lim1)
        # graph_pred_linear_list: max_seq_len x nn.Linear(d_model, num_tasks)
        self.w_pred = jax.random.uniform(k3, (max_seq_len, d_model, num_tasks),
                                         jnp.float32, -lim2, lim2)
        self.b_pred = jax.random.uniform(k4, (max_seq_len, num_tasks),
                                         jnp.float32, -lim2, lim2)

        # pre-stacked heads, PADDED to a multiple of 128 lanes
        # (column index = l*num_tasks + t; padded columns are zero).
        self.lt = max_seq_len * num_tasks
        self.lt_pad = _round_up(self.lt, LANE)
        w_all = jnp.transpose(self.w_pred, (1, 0, 2)).reshape(d_model, self.lt)
        self.w_all = jnp.pad(w_all, ((0, 0), (0, self.lt_pad - self.lt)))
        self.b_all = jnp.pad(self.b_pred.reshape(1, self.lt),
                             ((0, 0), (0, self.lt_pad - self.lt)))
        # bf16 operand copies (MXU native rate, half the HBM/DMA bytes)
        self.w_g2t_bf = self.w_g2t.astype(jnp.bfloat16)
        self.w_all_bf = self.w_all.astype(jnp.bfloat16)

        self.pe = positional_encoding_table(5000, d_model) if pos_encoder else None

    def forward(self, h_node, batch):
        batch_np = np.asarray(batch)
        n_graphs = int(batch_np.max()) + 1
        num_nodes = np.bincount(batch_np, minlength=n_graphs)
        s = int(min(int(num_nodes.max()), self.max_input_len))

        if self.graph_pooling in ("last", "cls"):
            # end-aligned pad_batch => transformer_out[-1][g] is graph g's last
            # (projected) node; only those B rows of h_node are ever needed.
            last_idx = np.zeros(n_graphs, np.int32)
            for g in range(n_graphs):
                nodes = np.nonzero(batch_np == g)[0]
                if len(nodes) > 0:
                    last_idx[g] = nodes[-1]
            valid = jnp.asarray((num_nodes > 0).astype(np.float32)).reshape(-1, 1)
            x_last = h_node[jnp.asarray(last_idx)]
            pe_last = (self.pe[s - 1:s] if self.pe is not None
                       else jnp.zeros((1, self.d_model), jnp.float32))
            # fold PE into the head bias exactly: (x+pe)@W + b == x@W + (pe@W+b)
            bh_eff = pe_last @ self.w_all + self.b_all
            out = fused_last_head(x_last, valid, self.w_g2t_bf, self.b_g2t,
                                  self.w_all_bf, bh_eff)
        elif self.graph_pooling == "mean":
            h = gnn2transformer_linear(h_node, self.w_g2t_bf, self.b_g2t)
            padded, src_mask, _, _, s = pad_batch(h, batch, self.max_input_len)
            # exact: sum_s (x + pe) == sum_s x + sum_s pe
            pe_sum = (jnp.sum(self.pe[:s], axis=0, keepdims=True)
                      if self.pe is not None
                      else jnp.zeros((1, self.d_model), jnp.float32))
            # reference quirk preserved: denominator is src_padding_mask.sum(-1)
            # (count of PADDED slots); may be 0 for the largest graph -> inf.
            inv = 1.0 / jnp.sum(src_mask.astype(jnp.float32),
                                axis=-1, keepdims=True)
            out = mean_head(padded, pe_sum, inv, self.w_all_bf, self.b_all)
        else:
            raise NotImplementedError(self.graph_pooling)

        out = out[:, :self.lt]                       # drop lane padding
        # [B, L*T] -> [L, B, T]; preds[i] == graph_pred_linear_list[i](h_graph)
        return jnp.transpose(
            out.reshape(n_graphs, self.max_seq_len, self.num_tasks), (1, 0, 2))

    # pure-JAX f32 reference for correctness checking (mirrors the torch module)
    def forward_ref(self, h_node, batch):
        h = h_node @ self.w_g2t + self.b_g2t
        padded, src_mask, _, _, s = pad_batch(h, batch, self.max_input_len)
        x = padded + (self.pe[:s][:, None, :] if self.pe is not None else 0.0)
        if self.graph_pooling in ("last", "cls"):
            hg = x[-1]
        elif self.graph_pooling == "mean":
            hg = x.sum(0) / jnp.sum(src_mask.astype(jnp.float32),
                                    axis=-1, keepdims=True)
        else:
            raise NotImplementedError
        return [hg @ self.w_pred[i] + self.b_pred[i]
                for i in range(self.max_seq_len)]


# --------------------------------------------------------------------------

if __name__ == "__main__":
    num_tasks = 5
    gnn_emb_dim = 16
    d_model = 32
    max_seq_len = 4

    graph_sizes = [7, 5, 8]              # 3 graphs, 20 nodes total
    total_nodes = int(sum(graph_sizes))
    batch = jnp.asarray(np.repeat(np.arange(len(graph_sizes)), graph_sizes),
                        jnp.int32)
    h_node = jax.random.normal(jax.random.PRNGKey(0),
                               (total_nodes, gnn_emb_dim), jnp.float32)

    # tolerances are loose because the kernels use bf16 MXU operands (a
    # requested optimization) while the reference is pure f32.
    RTOL, ATOL = 1e-1, 1.5e-1

    # --- 'last' pooling (primary GraphTrans setting, fully fused kernel) ---
    model = GNNTransformerPallas(num_tasks, gnn_emb_dim, d_model, max_seq_len,
                                 max_input_len=16, graph_pooling="last",
                                 pos_encoder=True, seed=0)
    preds = jax.block_until_ready(model.forward(h_node, batch))   # [L, B, T]
    ref = model.forward_ref(h_node, batch)
    for i in range(max_seq_len):
        np.testing.assert_allclose(np.asarray(preds[i]), np.asarray(ref[i]),
                                   rtol=RTOL, atol=ATOL)

    # --- 'mean' pooling path (projection kernel + S-tiled mean head kernel) ---
    model_m = GNNTransformerPallas(num_tasks, gnn_emb_dim, d_model, max_seq_len,
                                   max_input_len=16, graph_pooling="mean",
                                   pos_encoder=True, seed=0)
    preds_m = np.asarray(jax.block_until_ready(model_m.forward(h_node, batch)))
    ref_m = np.asarray(jnp.stack(model_m.forward_ref(h_node, batch)))
    # reference denominator (padded-slot count) can be 0 -> inf; compare only
    # where both are finite (the quirk is reproduced, not fixed).
    finite = np.isfinite(ref_m) & np.isfinite(preds_m)
    np.testing.assert_allclose(preds_m[finite], ref_m[finite],
                               rtol=RTOL, atol=ATOL)

    print("KERNEL_OK")
</pallas_src>

<mosaic_0001>
module attributes {stable_mosaic.version = 11 : i64} {
  func.func @_fused_last_kernel(%arg0: i32, %arg1: memref<3x16xbf16, #tpu.memory_space<vmem>>, %arg2: memref<3x1xf32, #tpu.memory_space<vmem>>, %arg3: memref<16x32xbf16, #tpu.memory_space<vmem>>, %arg4: memref<1x32xf32, #tpu.memory_space<vmem>>, %arg5: memref<32x128xbf16, #tpu.memory_space<vmem>>, %arg6: memref<1x128xf32, #tpu.memory_space<vmem>>, %arg7: memref<3x128xf32, #tpu.memory_space<vmem>>) attributes {dimension_semantics = [#tpu.dimension_semantics<parallel>], iteration_bounds = array<i64: 1>, scalar_prefetch = 0 : i64, scratch_operands = 0 : i64, tpu.core_type = #tpu.core_type<tc>, window_params = [{transform_indices = @transform_0, window_bounds = array<i64: 3, 16>}, {transform_indices = @transform_1, window_bounds = array<i64: 3, 1>}, {pipeline_mode = #tpu.pipeline_mode<synchronous>, transform_indices = @transform_2, window_bounds = array<i64: 16, 32>}, {pipeline_mode = #tpu.pipeline_mode<synchronous>, transform_indices = @transform_3, window_bounds = array<i64: 1, 32>}, {pipeline_mode = #tpu.pipeline_mode<synchronous>, transform_indices = @transform_4, window_bounds = array<i64: 32, 128>}, {pipeline_mode = #tpu.pipeline_mode<synchronous>, transform_indices = @transform_5, window_bounds = array<i64: 1, 128>}, {transform_indices = @transform_6, window_bounds = array<i64: 3, 128>}]} {
    %c0 = arith.constant 0 : index
    %c0_0 = arith.constant 0 : index
    %0 = vector.load %arg1[%c0, %c0_0] : memref<3x16xbf16, #tpu.memory_space<vmem>>, vector<3x16xbf16>
    %c0_1 = arith.constant 0 : index
    %c0_2 = arith.constant 0 : index
    %1 = vector.load %arg3[%c0_1, %c0_2] : memref<16x32xbf16, #tpu.memory_space<vmem>>, vector<16x32xbf16>
    %cst = arith.constant dense<0.000000e+00> : vector<3x32xf32>
    %2 = tpu.matmul %0, %1, %cst {dimension_numbers = #tpu.dot_dimension_numbers<[1], [0], [0], [1], [0, 0, 1, 1], [], []>} : vector<3x16xbf16>, vector<16x32xbf16>, vector<3x32xf32> -> vector<3x32xf32>
    %c0_3 = arith.constant 0 : index
    %c0_4 = arith.constant 0 : index
    %3 = vector.load %arg4[%c0_3, %c0_4] : memref<1x32xf32, #tpu.memory_space<vmem>>, vector<1x32xf32>
    %4 = vector.broadcast %3 : vector<1x32xf32> to vector<3x32xf32>
    %5 = arith.addf %2, %4 : vector<3x32xf32>
    %c0_5 = arith.constant 0 : index
    %c0_6 = arith.constant 0 : index
    %6 = vector.load %arg2[%c0_5, %c0_6] : memref<3x1xf32, #tpu.memory_space<vmem>>, vector<3x1xf32>
    %7 = vector.broadcast %6 : vector<3x1xf32> to vector<3x32xf32>
    %8 = arith.mulf %5, %7 : vector<3x32xf32>
    %9 = arith.truncf %8 : vector<3x32xf32> to vector<3x32xbf16>
    %c0_7 = arith.constant 0 : index
    %c0_8 = arith.constant 0 : index
    %10 = vector.load %arg5[%c0_7, %c0_8] : memref<32x128xbf16, #tpu.memory_space<vmem>>, vector<32x128xbf16>
    %cst_9 = arith.constant dense<0.000000e+00> : vector<3x128xf32>
    %11 = tpu.matmul %9, %10, %cst_9 {dimension_numbers = #tpu.dot_dimension_numbers<[1], [0], [0], [1], [0, 0, 1, 1], [], []>} : vector<3x32xbf16>, vector<32x128xbf16>, vector<3x128xf32> -> vector<3x128xf32>
    %c0_10 = arith.constant 0 : index
    %c0_11 = arith.constant 0 : index
    %12 = vector.load %arg6[%c0_10, %c0_11] : memref<1x128xf32, #tpu.memory_space<vmem>>, vector<1x128xf32>
    %13 = vector.broadcast %12 : vector<1x128xf32> to vector<3x128xf32>
    %14 = arith.addf %11, %13 : vector<3x128xf32>
    %c0_12 = arith.constant 0 : index
    %c0_13 = arith.constant 0 : index
    %15 = vector.load %arg7[%c0_12, %c0_13] : memref<3x128xf32, #tpu.memory_space<vmem>>, vector<3x128xf32>
    tpu.vector_store %arg7[%c0_12, %c0_13], %14 {strides = array<i32>} : memref<3x128xf32, #tpu.memory_space<vmem>>, vector<3x128xf32>,
    return
  }
  func.func @transform_0(%arg0: i32) -> (i32, i32) {
    %c0_i32 = arith.constant 0 : i32
    %c0_i32_0 = arith.constant 0 : i32
    return %arg0, %c0_i32 : i32, i32
  }
  func.func @transform_1(%arg0: i32) -> (i32, i32) {
    %c0_i32 = arith.constant 0 : i32
    %c0_i32_0 = arith.constant 0 : i32
    return %arg0, %c0_i32 : i32, i32
  }
  func.func @transform_2(%arg0: i32) -> (i32, i32) {
    %c0_i32 = arith.constant 0 : i32
    %c0_i32_0 = arith.constant 0 : i32
    %c0_i32_1 = arith.constant 0 : i32
    return %c0_i32, %c0_i32_0 : i32, i32
  }
  func.func @transform_3(%arg0: i32) -> (i32, i32) {
    %c0_i32 = arith.constant 0 : i32
    %c0_i32_0 = arith.constant 0 : i32
    %c0_i32_1 = arith.constant 0 : i32
    return %c0_i32, %c0_i32_0 : i32, i32
  }
  func.func @transform_4(%arg0: i32) -> (i32, i32) {
    %c0_i32 = arith.constant 0 : i32
    %c0_i32_0 = arith.constant 0 : i32
    %c0_i32_1 = arith.constant 0 : i32
    return %c0_i32, %c0_i32_0 : i32, i32
  }
  func.func @transform_5(%arg0: i32) -> (i32, i32) {
    %c0_i32 = arith.constant 0 : i32
    %c0_i32_0 = arith.constant 0 : i32
    %c0_i32_1 = arith.constant 0 : i32
    return %c0_i32, %c0_i32_0 : i32, i32
  }
  func.func @transform_6(%arg0: i32) -> (i32, i32) {
    %c0_i32 = arith.constant 0 : i32
    %c0_i32_0 = arith.constant 0 : i32
    return %arg0, %c0_i32 : i32, i32
  }
}

</mosaic_0001>

<bundles_post_ra>
// kernel: tpu_custom_call.1
= control target key start
LH: loop header
LB: loop body
LE: loop exit
PB: predicated region body
PF: predicated region fallthrough
CT: control target
= control target key end

     0   :  { %11 = vsyncpa [#allocation3], 0  ;;  %s317_s0 = inlined_call_operand.vmem [shape: bf16[3,16], index: 0, kind: input, shape index: {}]   ;;  %s318_s1 = inlined_call_operand.vmem [shape: f32[3,1], index: 1, kind: input, shape index: {}]   ;;  %s319_s2 = inlined_call_operand.hbm [shape: bf16[16,32], index: 2, kind: input, shape index: {}]   ;;  %s320_s3 = inlined_call_operand.vmem [shape: f32[1,32], index: 3, kind: input, shape index: {}]   ;;  %s321_s4 = inlined_call_operand.hbm [shape: bf16[32,128], index: 4, kind: input, shape index: {}]   ;;  %s322_s5 = inlined_call_operand.vmem [shape: f32[1,128], index: 5, kind: input, shape index: {}]   ;;  %s323_s6 = inlined_call_operand.hbm [shape: f32[3,128], index: 6, kind: output, shape index: {}]  }
   0x1   :  { %12 = vsyncpa [#allocation6], 0 }
   0x2   :  { %13 = vsyncpa [#allocation4], 0  ;;  %s22_s23 = sshll.u32 %s319_s2, 4  ;;  %s255_s24 = smov [#allocation2]   ;;  %s23_s23 = int_to_ptr.hbm [resolvable:$true] %s22_s23 }
   0x3   :  { %s24_s25 = sshll.u32 %s255_s24, 4  ;;  %s37_s28 = sshll.u32 %s321_s4, 4  ;;  %s25_s25 = int_to_ptr.vmem [resolvable:$true] %s24_s25  ;;  %s38_s28 = int_to_ptr.hbm [resolvable:$true] %s37_s28 }
   0x4   :  { %s256_s29 = smov 64   ;;  %s257_s30 = smov 4  }
   0x5   :  { %30 = dma.hbm_to_vmem [thread:$0]  %s23_s23, 128, %s25_s25, [#allocation3], %s256_s29, %s256_s29, %s257_s30  }
   0x6   :  { %s258_s7 = smov [#allocation5]  }
   0x7   :  { %s39_s8 = sshll.u32 %s258_s7, 4  ;;  %s40_s8 = int_to_ptr.vmem [resolvable:$true] %s39_s8 }
   0x8   :  { %45 = dma.hbm_to_vmem [thread:$0]  %s38_s28, 256, %s40_s8, [#allocation6], %s256_s29, %s256_s29, %s257_s30  }
   0x9   :  { %249 = dma.done.wait [#allocation3], 128  }
   0xa   :  { %250 = vsyncadd [#allocation3], 4294967168 }
   0xb   :  { %251 = dma.done.wait [#allocation6], 256  }
   0xc   :  { %252 = vsyncadd [#allocation6], 4294967040  ;;  %v259_v0 = vmov 0   ;;  %v165_v1 = vld [vmem:[#allocation2] sm:$0xff]  ;;  %vm70_vm0 = vcmask 130048   ;;  %v167_v4 = vld [vmem:[#allocation5 + $0x8] sm:$0xff] }
   0xd   :  { %174 = vset.pattern.permute.xlu0 %v259_v0  ;;  %v87_v2 = vld [vmem:[%s318_s1] sm:$0x7]  ;;  %81 = vmatpush.bf16.msra.mxu0 %v165_v1  ;;  %v166_v5 = vld [vmem:[#allocation5] sm:$0xff]  ;;  %vm115_vm1 = vcmask 261120   ;;  %s260_s13 = smov [#allocation7]   ;;  %s140_s17 = sshll.u32 %s323_s6, 4  ;;  %s141_s17 = int_to_ptr.hbm [resolvable:$true] %s140_s17 }
   0xe   :  { %90 = vperm.xlu0 %174, %v87_v2   ;;  %v57_v3 = vld [vmem:[%s317_s0] sm:$0x3]  ;;  %125 = vmatpush.bf16.msra.mxu1 %v167_v4  ;;  %s138_s14 = sshll.u32 %s260_s13, 4  ;;  %s139_s14 = int_to_ptr.vmem [resolvable:$true] %s138_s14 }
   0xf   :  { %v175_v6 = vld [vmem:[%s320_s3] ss:$0 sm:$0xff] }
  0x10   :  { %155 = vmatmul.msk.bf16.vlgmr.msra.gmra.mxu0 %vm70_vm0, %v57_v3  ;;  %v176_v13 = vld [vmem:[%s322_s5] ss:$0 sm:$0xff] }
  0x12   :  { %126 = vmatpush.bf16.msra.mxu1 %v166_v5 }
  0x80   :  { %v91_v8 = vpop.permute.xlu0 %90 }
  0x8d   :  { %v83_v7 = vpop.f32.mrf.mxu0 }
  0x8e   :  { %v84_v9 = vadd.f32 %v175_v6, %v83_v7 }
  0x90   :  { %v93_v10 = vmul.f32 %v91_v8, %v84_v9 }
  0x92   :  { %v94_v11 = vpack.c.bf16 %v93_v10, %v93_v10 }
  0x94   :  { %164 = vmatmul.msk.bf16.vlgmr.msra.gmra.mxu1 %vm115_vm1, %v94_v11 }
  0x95   :  { %v85_v12 = vpop.f32.mrf.mxu0 }
 0x111   :  { %v128_v14 = vpop.f32.mrf.mxu1 }
 0x112   :  { %v129_v15 = vadd.f32 %v176_v13, %v128_v14 }
 0x114   :  { %132 = vst [vmem:[#allocation7] sm:$0x7] %v129_v15 }
 0x115   :  { %143 = dma.vmem_to_hbm [thread:$0]  %s139_s14, 64, %s141_s17, [#allocation4]  }
 0x119   :  { %v130_v16 = vpop.f32.mrf.mxu1 }
 0x11a   :  { %253 = dma.done.wait [#allocation4], 64  }
 0x11b   :  { %254 = vsyncadd [#allocation4], 4294967232 }
 0x11c   :  { %148 = vsyncpa [#allocation3], 1 }
 0x11d   :  { %149 = vsyncpa [#allocation6], 1 }
 0x11e   :  { %150 = vsyncpa [#allocation4], 1 }

</bundles_post_ra>
